<compile_context>
chip_gen: v5e
topology: v5e:2x2
jax: 0.10.0
libtpu: 0.0.40
codegen_flags: <defaults>
</compile_context>

<pallas_src>
import functools

import jax
import jax.numpy as jnp
from jax.experimental import pallas as pl
from jax.experimental.pallas import tpu as pltpu


def _round_up(x, m):
    return ((x + m - 1) // m) * m


def _mlp_fused_kernel(*refs, num_layers):
    """refs = (x_ref, w0, b0, w1, b1, ..., o_ref); all tiles VMEM-resident."""
    x_ref = refs[0]
    o_ref = refs[-1]
    h = x_ref[...].astype(jnp.bfloat16)               # bf16 MXU operand
    for i in range(num_layers):                        # static unroll
        w = refs[1 + 2 * i][...]                       # bf16 (Kin, Kout)
        b = refs[2 + 2 * i][...]                       # f32  (1,   Kout)
        h = jnp.dot(h, w, preferred_element_type=jnp.float32) + b
        if i < num_layers - 1:
            h = jnp.maximum(h, 0.0)                    # fused ReLU (f32 VPU)
            h = h.astype(jnp.bfloat16)                 # bf16 for next MXU pass
    o_ref[...] = h.astype(o_ref.dtype)


def _choose_tiling(M, tile_m):
    """Adaptive row tiling: small padding, even grid >= 2 for v7x megacore."""
    num_tiles = max(1, pl.cdiv(M, tile_m))
    if M >= 16:
        num_tiles = max(2, num_tiles)                  # use both TCs on v7x
        if num_tiles % 2:
            num_tiles += 1                             # even split across TCs
    tile = _round_up(pl.cdiv(M, num_tiles), 8)         # sublane-aligned
    grid_m = pl.cdiv(M, tile)
    m_pad = grid_m * tile
    return tile, grid_m, m_pad


def mlp_fused_pallas(x2d, weights_bf16, biases_f32, *, output_dim, tile_m=1024):
    """x2d: (M, input_dim) f32; weights bf16 (Kin, Kout); biases f32 (1, Kout)."""
    M, K0 = x2d.shape
    num_layers = len(weights_bf16)

    tile, grid_m, m_pad = _choose_tiling(M, tile_m)
    xp = x2d if m_pad == M else jnp.pad(x2d, ((0, m_pad - M), (0, 0)))

    in_specs = [pl.BlockSpec((tile, K0), lambda i: (i, 0))]        # streamed
    operands = [xp]
    flops = 0
    bytes_accessed = xp.size * 4 + m_pad * output_dim * 4
    for w, b in zip(weights_bf16, biases_f32):
        kin, kout = w.shape
        in_specs.append(pl.BlockSpec((kin, kout), lambda i: (0, 0)))   # resident
        in_specs.append(pl.BlockSpec((1, kout), lambda i: (0, 0)))     # resident
        operands.extend([w, b])
        flops += 2 * m_pad * kin * kout
        bytes_accessed += w.size * 2 + b.size * 4

    out = pl.pallas_call(
        functools.partial(_mlp_fused_kernel, num_layers=num_layers),
        out_shape=jax.ShapeDtypeStruct((m_pad, output_dim), x2d.dtype),
        grid_spec=pltpu.PrefetchScalarGridSpec(
            num_scalar_prefetch=0,
            grid=(grid_m,),
            in_specs=in_specs,
            out_specs=pl.BlockSpec((tile, output_dim), lambda i: (i, 0)),
        ),
        compiler_params=pltpu.CompilerParams(
            dimension_semantics=("parallel",),        # shard rows over TCs (v7x)
            vmem_limit_bytes=32 * 1024 * 1024,        # ample; tiles are tiny
        ),
        cost_estimate=pl.CostEstimate(
            flops=flops, transcendentals=0, bytes_accessed=bytes_accessed),
    )(*operands)
    return out[:M] if m_pad != M else out


class MLP:
    """JAX/Pallas port of the Deformable-DETR MLP module."""

    def __init__(self, input_dim, hidden_dim, output_dim, num_layers, key):
        self.num_layers = num_layers
        self.output_dim = output_dim
        h = [hidden_dim] * (num_layers - 1)
        dims = list(zip([input_dim] + h, h + [output_dim]))
        self.params = []        # f32 (in, out)/(out,) — reference truth
        self.weights_bf16 = []  # bf16 MXU operands, natural (unpadded) shapes
        self.biases_f32 = []    # f32 (1, out) for the in-kernel epilogue
        for (n_in, n_out) in dims:
            key, kw, kb = jax.random.split(key, 3)
            # PyTorch-style uniform(-1/sqrt(fan_in), 1/sqrt(fan_in)); stored (in, out)
            bound = 1.0 / (n_in ** 0.5)
            w = jax.random.uniform(kw, (n_in, n_out), jnp.float32, -bound, bound)
            b = jax.random.uniform(kb, (n_out,), jnp.float32, -bound, bound)
            self.params.append((w, b))
            self.weights_bf16.append(w.astype(jnp.bfloat16))
            self.biases_f32.append(b.reshape(1, n_out))

    def __call__(self, x):
        # x: (..., input_dim) -> flatten leading dims to token rows
        lead = x.shape[:-1]
        xm = x.reshape(-1, x.shape[-1])
        y = mlp_fused_pallas(xm, self.weights_bf16, self.biases_f32,
                             output_dim=self.output_dim)
        return y.reshape(*lead, self.output_dim)


if __name__ == "__main__":
    key = jax.random.PRNGKey(0)
    key, kx, kp = jax.random.split(key, 3)

    # small shapes consistent with the DETR bbox-head MLP (3 layers)
    batch, num_queries = 2, 8
    input_dim, hidden_dim, output_dim, num_layers = 32, 32, 8, 3

    x = jax.random.normal(kx, (batch, num_queries, input_dim), jnp.float32)

    mlp = MLP(input_dim, hidden_dim, output_dim, num_layers, kp)
    out = mlp(x)
    out = jax.block_until_ready(out)

    # pure-JAX f32 reference check against the unquantized parameters
    ref = x.reshape(-1, input_dim)
    for i, (w, b) in enumerate(mlp.params):
        ref = ref @ w + b
        if i < num_layers - 1:
            ref = jnp.maximum(ref, 0.0)
    ref = ref.reshape(batch, num_queries, output_dim)
    assert out.shape == (batch, num_queries, output_dim)
    # bf16 MXU operands with f32 accumulation -> relaxed tolerance vs f32 ref
    assert jnp.allclose(out, ref, atol=3e-2, rtol=3e-2)

    print("KERNEL_OK")
</pallas_src>

<mosaic_0001>
module attributes {stable_mosaic.version = 11 : i64} {
  func.func @_mlp_fused_kernel(%arg0: i32, %arg1: memref<8x32xf32, #tpu.memory_space<vmem>>, %arg2: memref<32x32xbf16, #tpu.memory_space<vmem>>, %arg3: memref<1x32xf32, #tpu.memory_space<vmem>>, %arg4: memref<32x32xbf16, #tpu.memory_space<vmem>>, %arg5: memref<1x32xf32, #tpu.memory_space<vmem>>, %arg6: memref<32x8xbf16, #tpu.memory_space<vmem>>, %arg7: memref<1x8xf32, #tpu.memory_space<vmem>>, %arg8: memref<8x8xf32, #tpu.memory_space<vmem>>) attributes {dimension_semantics = [#tpu.dimension_semantics<parallel>], iteration_bounds = array<i64: 2>, scalar_prefetch = 0 : i64, scratch_operands = 0 : i64, tpu.core_type = #tpu.core_type<tc>, window_params = [{transform_indices = @transform_0, window_bounds = array<i64: 8, 32>}, {pipeline_mode = #tpu.pipeline_mode<synchronous>, transform_indices = @transform_1, window_bounds = array<i64: 32, 32>}, {pipeline_mode = #tpu.pipeline_mode<synchronous>, transform_indices = @transform_2, window_bounds = array<i64: 1, 32>}, {pipeline_mode = #tpu.pipeline_mode<synchronous>, transform_indices = @transform_3, window_bounds = array<i64: 32, 32>}, {pipeline_mode = #tpu.pipeline_mode<synchronous>, transform_indices = @transform_4, window_bounds = array<i64: 1, 32>}, {pipeline_mode = #tpu.pipeline_mode<synchronous>, transform_indices = @transform_5, window_bounds = array<i64: 32, 8>}, {pipeline_mode = #tpu.pipeline_mode<synchronous>, transform_indices = @transform_6, window_bounds = array<i64: 1, 8>}, {transform_indices = @transform_7, window_bounds = array<i64: 8, 8>}]} {
    %c0 = arith.constant 0 : index
    %c0_0 = arith.constant 0 : index
    %0 = vector.load %arg1[%c0, %c0_0] : memref<8x32xf32, #tpu.memory_space<vmem>>, vector<8x32xf32>
    %1 = arith.truncf %0 : vector<8x32xf32> to vector<8x32xbf16>
    %c0_1 = arith.constant 0 : index
    %c0_2 = arith.constant 0 : index
    %2 = vector.load %arg2[%c0_1, %c0_2] : memref<32x32xbf16, #tpu.memory_space<vmem>>, vector<32x32xbf16>
    %c0_3 = arith.constant 0 : index
    %c0_4 = arith.constant 0 : index
    %3 = vector.load %arg3[%c0_3, %c0_4] : memref<1x32xf32, #tpu.memory_space<vmem>>, vector<1x32xf32>
    %cst = arith.constant dense<0.000000e+00> : vector<8x32xf32>
    %4 = tpu.matmul %1, %2, %cst {dimension_numbers = #tpu.dot_dimension_numbers<[1], [0], [0], [1], [0, 0, 1, 1], [], []>} : vector<8x32xbf16>, vector<32x32xbf16>, vector<8x32xf32> -> vector<8x32xf32>
    %5 = vector.broadcast %3 : vector<1x32xf32> to vector<8x32xf32>
    %6 = arith.addf %4, %5 : vector<8x32xf32>
    %cst_5 = arith.constant 0.000000e+00 : f32
    %7 = vector.broadcast %cst_5 : f32 to vector<8x32xf32>
    %8 = arith.maximumf %6, %7 : vector<8x32xf32>
    %9 = arith.truncf %8 : vector<8x32xf32> to vector<8x32xbf16>
    %c0_6 = arith.constant 0 : index
    %c0_7 = arith.constant 0 : index
    %10 = vector.load %arg4[%c0_6, %c0_7] : memref<32x32xbf16, #tpu.memory_space<vmem>>, vector<32x32xbf16>
    %c0_8 = arith.constant 0 : index
    %c0_9 = arith.constant 0 : index
    %11 = vector.load %arg5[%c0_8, %c0_9] : memref<1x32xf32, #tpu.memory_space<vmem>>, vector<1x32xf32>
    %cst_10 = arith.constant dense<0.000000e+00> : vector<8x32xf32>
    %12 = tpu.matmul %9, %10, %cst_10 {dimension_numbers = #tpu.dot_dimension_numbers<[1], [0], [0], [1], [0, 0, 1, 1], [], []>} : vector<8x32xbf16>, vector<32x32xbf16>, vector<8x32xf32> -> vector<8x32xf32>
    %13 = vector.broadcast %11 : vector<1x32xf32> to vector<8x32xf32>
    %14 = arith.addf %12, %13 : vector<8x32xf32>
    %cst_11 = arith.constant 0.000000e+00 : f32
    %15 = vector.broadcast %cst_11 : f32 to vector<8x32xf32>
    %16 = arith.maximumf %14, %15 : vector<8x32xf32>
    %17 = arith.truncf %16 : vector<8x32xf32> to vector<8x32xbf16>
    %c0_12 = arith.constant 0 : index
    %c0_13 = arith.constant 0 : index
    %18 = vector.load %arg6[%c0_12, %c0_13] : memref<32x8xbf16, #tpu.memory_space<vmem>>, vector<32x8xbf16>
    %c0_14 = arith.constant 0 : index
    %c0_15 = arith.constant 0 : index
    %19 = vector.load %arg7[%c0_14, %c0_15] : memref<1x8xf32, #tpu.memory_space<vmem>>, vector<1x8xf32>
    %cst_16 = arith.constant dense<0.000000e+00> : vector<8x8xf32>
    %20 = tpu.matmul %17, %18, %cst_16 {dimension_numbers = #tpu.dot_dimension_numbers<[1], [0], [0], [1], [0, 0, 1, 1], [], []>} : vector<8x32xbf16>, vector<32x8xbf16>, vector<8x8xf32> -> vector<8x8xf32>
    %21 = vector.broadcast %19 : vector<1x8xf32> to vector<8x8xf32>
    %22 = arith.addf %20, %21 : vector<8x8xf32>
    %c0_17 = arith.constant 0 : index
    %c0_18 = arith.constant 0 : index
    %23 = vector.load %arg8[%c0_17, %c0_18] : memref<8x8xf32, #tpu.memory_space<vmem>>, vector<8x8xf32>
    tpu.vector_store %arg8[%c0_17, %c0_18], %22 {strides = array<i32>} : memref<8x8xf32, #tpu.memory_space<vmem>>, vector<8x8xf32>,
    return
  }
  func.func @transform_0(%arg0: i32) -> (i32, i32) {
    %c0_i32 = arith.constant 0 : i32
    %c0_i32_0 = arith.constant 0 : i32
    return %arg0, %c0_i32 : i32, i32
  }
  func.func @transform_1(%arg0: i32) -> (i32, i32) {
    %c0_i32 = arith.constant 0 : i32
    %c0_i32_0 = arith.constant 0 : i32
    %c0_i32_1 = arith.constant 0 : i32
    return %c0_i32, %c0_i32_0 : i32, i32
  }
  func.func @transform_2(%arg0: i32) -> (i32, i32) {
    %c0_i32 = arith.constant 0 : i32
    %c0_i32_0 = arith.constant 0 : i32
    %c0_i32_1 = arith.constant 0 : i32
    return %c0_i32, %c0_i32_0 : i32, i32
  }
  func.func @transform_3(%arg0: i32) -> (i32, i32) {
    %c0_i32 = arith.constant 0 : i32
    %c0_i32_0 = arith.constant 0 : i32
    %c0_i32_1 = arith.constant 0 : i32
    return %c0_i32, %c0_i32_0 : i32, i32
  }
  func.func @transform_4(%arg0: i32) -> (i32, i32) {
    %c0_i32 = arith.constant 0 : i32
    %c0_i32_0 = arith.constant 0 : i32
    %c0_i32_1 = arith.constant 0 : i32
    return %c0_i32, %c0_i32_0 : i32, i32
  }
  func.func @transform_5(%arg0: i32) -> (i32, i32) {
    %c0_i32 = arith.constant 0 : i32
    %c0_i32_0 = arith.constant 0 : i32
    %c0_i32_1 = arith.constant 0 : i32
    return %c0_i32, %c0_i32_0 : i32, i32
  }
  func.func @transform_6(%arg0: i32) -> (i32, i32) {
    %c0_i32 = arith.constant 0 : i32
    %c0_i32_0 = arith.constant 0 : i32
    %c0_i32_1 = arith.constant 0 : i32
    return %c0_i32, %c0_i32_0 : i32, i32
  }
  func.func @transform_7(%arg0: i32) -> (i32, i32) {
    %c0_i32 = arith.constant 0 : i32
    %c0_i32_0 = arith.constant 0 : i32
    return %arg0, %c0_i32 : i32, i32
  }
}

</mosaic_0001>

<bundles_post_ra>
// kernel: tpu_custom_call.1
= control target key start
LH: loop header
LB: loop body
LE: loop exit
PB: predicated region body
PF: predicated region fallthrough
CT: control target
= control target key end

     0   :  { %12 = vsyncpa [#allocation3], 0  ;;  %s762_s0 = inlined_call_operand.vmem [shape: f32[16,32], index: 0, kind: input, shape index: {}]   ;;  %s763_s1 = inlined_call_operand.hbm [shape: bf16[32,32], index: 1, kind: input, shape index: {}]   ;;  %s764_s2 = inlined_call_operand.vmem [shape: f32[1,32], index: 2, kind: input, shape index: {}]   ;;  %s765_s3 = inlined_call_operand.hbm [shape: bf16[32,32], index: 3, kind: input, shape index: {}]   ;;  %s766_s4 = inlined_call_operand.vmem [shape: f32[1,32], index: 4, kind: input, shape index: {}]   ;;  %s767_s5 = inlined_call_operand.vmem [shape: bf16[32,8], index: 5, kind: input, shape index: {}]   ;;  %s768_s6 = inlined_call_operand.vmem [shape: f32[1,8], index: 6, kind: input, shape index: {}]   ;;  %s769_s7 = inlined_call_operand.vmem [shape: f32[16,8], index: 7, kind: output, shape index: {}]  }
   0x1   :  { %13 = vsyncpa [#allocation5], 0  ;;  %s701_s24 = smov 0  }
   0x2 LB: > { %s213_s27 = sshll.u32 %s763_s1, 4  ;;  %s501_s28 = sadd.s32 4294967295, %s655_s24   ;;  %s655_s24 = sphi %s701_s24, %s19_s24   ;;  %s214_s27 = int_to_ptr.hbm [resolvable:$true] %s213_s27 }
   0x3   : > { %p503_p0 = scmp.ge.s32.totalorder %s655_s24, 1  ;;  %p202_p1 = scmp.lt.s32.totalorder %s655_s24, 3 }
   0x4   : > { %p562_p2 = scmp.eq.s32.totalorder %s501_s28, 0  ;;  %s657_s30 = smov [#allocation2]  }
   0x5   : > { %p712_p3 = pnand %p503_p0, %p202_p1  ;;  %s215_s8 = sshll.u32 %s657_s30, 4  ;;  %s216_s8 = int_to_ptr.vmem [resolvable:$true] %s215_s8 }
   0x6   : > { %s230_s11 = sshll.u32 %s765_s3, 4  ;;  %s658_s12 = smov [#allocation4]   ;;  %s231_s11 = int_to_ptr.hbm [resolvable:$true] %s230_s11 }
   0x7   : > { %p555_p4 = pneg %p712_p3  ;;  %s232_s13 = sshll.u32 %s658_s12, 4  ;;  %s233_s13 = int_to_ptr.vmem [resolvable:$true] %s232_s13 }
   0x8   : > { %s659_s14 = smov 64   ;;  %s660_s15 = smov 4  }
   0x9   : > { %p556_p5 = pnand %p562_p2, %p555_p4  ;;  %264 = sbr.rel (%p712_p3) target bundleno = 429 (0x1ad), region = 48 }
   0xb   : > { %558 = dma.hbm_to_vmem [thread:$0]  (!%p556_p5), %s214_s27, 256, %s216_s8, [#allocation3], %s659_s14, %s659_s14, %s660_s15  }
   0xc   : > { %561 = dma.hbm_to_vmem [thread:$0]  (!%p556_p5), %s231_s11, 256, %s233_s13, [#allocation5], %s659_s14, %s659_s14, %s660_s15  }
   0xe   : > { %646 = dma.done.wait (%p562_p2), [#allocation3], 256  }
   0xf   : > { %648 = vsyncadd (%p562_p2), [#allocation3], 4294967040 }
  0x10   : > { %650 = dma.done.wait (%p562_p2), [#allocation5], 256  }
  0x11   : > { %652 = vsyncadd (%p562_p2), [#allocation5], 4294967040  ;;  %p300_p6 = scmp.lt.s32.totalorder %s501_s28, 1  ;;  %v542_v0 = vld [vmem:[#allocation2 + $0x8] sm:$0xff]  ;;  %v541_v1 = vld [vmem:[#allocation2] sm:$0xff]  ;;  %vm331_vm0 = vcmask 261120  }
  0x12   : > { %341 = vmatpush.bf16.msra.mxu0 %v542_v0  ;;  %v544_v4 = vld [vmem:[#allocation4 + $0x8] sm:$0xff]  ;;  %v543_v5 = vld [vmem:[#allocation4] sm:$0xff]  ;;  %v578_v6 = vld [vmem:[%s764_s2] ss:$0 sm:$0xff]  ;;  %vm424_vm1 = vcmask 64512  }
  0x13   : > { %s772_s28 = smov (!%p300_p6, %s501_s28), 1  ;;  %379 = vmatpush.bf16.msra.mxu1 %v544_v4  ;;  %v546_v12 = vld [vmem:[%s767_s5 + $0x8] sm:$0xff]  ;;  %v545_v13 = vld [vmem:[%s767_s5] sm:$0xff] }
  0x14   : > { %s510_s16 = sshll.u32 %s772_s28, 3  ;;  %417 = vmatpush.bf16.msra.mxu2 %v546_v12  ;;  %v579_v14 = vld [vmem:[%s766_s4] ss:$0 sm:$0xff] }
  0x15   : > { %s303_s19 = scalar_lea.vmem %s762_s0, %s510_s16  ;;  %v580_v20 = vld [vmem:[%s768_s6] ss:$0 sm:$0xff]  ;;  %s307_s11 = scalar_lea.vmem %s769_s7, %s510_s16 }
  0x16   : > { %v309_v2 = vld [vmem:[%s303_s19] sm:$0xff]  ;;  %342 = vmatpush.bf16.msra.mxu0 %v541_v1 }
  0x17   : > { %v310_v3 = vpack.c.bf16 %v309_v2, %v309_v2  ;;  %380 = vmatpush.bf16.msra.mxu1 %v543_v5 }
  0x18   : > { %418 = vmatpush.bf16.msra.mxu2 %v545_v13 }
  0x19   : > { %520 = vmatmul.msk.bf16.vlgmr.msra.gmra.mxu0 %vm331_vm0, %v310_v3 }
  0x96   : > { %v344_v7 = vpop.f32.mrf.mxu0 }
  0x97   : > { %v345_v8 = vadd.f32 %v578_v6, %v344_v7 }
  0x99   : > { %v348_v9 = vmax.f32 %v345_v8, 0.0 }
  0x9b   : > { %v349_v10 = vpack.c.bf16 %v348_v9, %v348_v9 }
  0x9d   : > { %529 = vmatmul.msk.bf16.vlgmr.msra.gmra.mxu1 %vm331_vm0, %v349_v10 }
  0x9e   : > { %v346_v11 = vpop.f32.mrf.mxu0 }
 0x11a   : > { %v382_v15 = vpop.f32.mrf.mxu1 }
 0x11b   : > { %v383_v16 = vadd.f32 %v579_v14, %v382_v15 }
 0x11d   : > { %v386_v17 = vmax.f32 %v383_v16, 0.0 }
 0x11f   : > { %v387_v18 = vpack.c.bf16 %v386_v17, %v386_v17 }
 0x121   : > { %538 = vmatmul.msk.bf16.vlgmr.msra.gmra.mxu2 %vm331_vm0, %v387_v18 }
 0x122   : > { %v384_v19 = vpop.f32.mrf.mxu1 }
 0x1a4   : > { %v420_v21 = vpop.f32.mrf.mxu2 }
 0x1a5   : > { %v421_v22 = vadd.f32 %v580_v20, %v420_v21 }
 0x1a7   : > { %425 = vst.msk [vmem:[%s307_s11] sm:$0xff] %vm424_vm1, %v421_v22 }
 0x1ac   : > { %v422_v23 = vpop.f32.mrf.mxu2 }
 0x1ad PF: > { %s19_s24 = sadd.s32 1, %s655_s24  }
 0x1ae   : > { %p16_p7 = scmp.ge.s32.totalorder %s19_s24, 4  }
 0x1b0   :  { %18 = sbr.rel (!%p16_p7) target bundleno = 2 (0x2), region = 87 }
 0x1b5   :  { %445 = vsyncpa [#allocation3], 1 }
 0x1b6   :  { %447 = vsyncpa [#allocation3 + $0x1], 1 }
 0x1b7   :  { %448 = vsyncpa [#allocation5], 1 }

</bundles_post_ra>
